<compile_context>
chip_gen: v5e
topology: v5e:2x2
jax: 0.10.0
libtpu: 0.0.40
codegen_flags: <defaults>
</compile_context>

<pallas_src>
import functools

import jax
import jax.numpy as jnp
from jax.experimental import pallas as pl
from jax.experimental.pallas import tpu as pltpu

BN_EPS = 1e-5
_NEG_BIG = -1e30  # stand-in for -inf on padded label lanes


def _round_up(n, m):
    return ((n + m - 1) // m) * m


def _pad2(a, rows, cols):
    return jnp.pad(a, ((0, rows - a.shape[0]), (0, cols - a.shape[1])))


def _stats_kernel(x_ref, w1_ref, sum_ref, ssq_ref):
    """Accumulate per-feature sum / sum-of-squares of h = x @ W1 over the batch."""

    @pl.when(pl.program_id(0) == 0)
    def _init():
        sum_ref[...] = jnp.zeros_like(sum_ref)
        ssq_ref[...] = jnp.zeros_like(ssq_ref)

    h = jnp.dot(x_ref[...], w1_ref[...], preferred_element_type=jnp.float32)
    # Single pass over h: sum and sum-of-squares (var = E[h^2] - mean^2 later).
    sum_ref[...] += jnp.sum(h, axis=0, keepdims=True)
    ssq_ref[...] += jnp.sum(h * h, axis=0, keepdims=True)


def _apply_kernel(sum_ref, ssq_ref, gamma_ref, beta_ref, x_ref, w1_ref,
                  w2_ref, b2_ref, o_ref, *, inv_batch, n_labels):
    # Fold BatchNorm (batch stats) + affine into one per-feature scale/shift.
    mean = sum_ref[...] * inv_batch                        # [1, Hp]
    var = ssq_ref[...] * inv_batch - mean * mean           # biased variance
    scale = gamma_ref[...] * jax.lax.rsqrt(var + BN_EPS)   # [1, Hp]
    shift = beta_ref[...] - mean * scale                   # [1, Hp]

    # fc1 (bf16 operands, f32 accumulate) -> folded BN (mul+add) -> ReLU
    h = jnp.dot(x_ref[...], w1_ref[...], preferred_element_type=jnp.float32)
    h = jnp.maximum(h * scale + shift, 0.0)

    # fc2 (f32) + bias
    logits = jnp.dot(h, w2_ref[...], preferred_element_type=jnp.float32) + b2_ref[...]

    # Mask padded label lanes before the log-softmax reductions.
    lane = jax.lax.broadcasted_iota(jnp.int32, logits.shape, 1)
    logits = jnp.where(lane < n_labels, logits, _NEG_BIG)

    m = jnp.max(logits, axis=1, keepdims=True)
    shifted = logits - m
    lse = jnp.log(jnp.sum(jnp.exp(shifted), axis=1, keepdims=True))
    o_ref[...] = shifted - lse


def adversarial_network_dann(x, w1, b1, gamma, beta, w2, b2, *, batch_tile=512):
    """x: [B, input_dim]; w1: [hidden, input] (PyTorch layout); w2: [labels, hidden]."""
    del b1  # cancelled exactly by the training-mode BatchNorm mean subtraction

    B, D = x.shape
    H = w1.shape[0]
    L = w2.shape[0]

    Dp = _round_up(D, 128)
    Hp = _round_up(H, 128)
    Lp = _round_up(L, 128)
    TB = min(batch_tile, _round_up(B, 8))   # batch-tile rows (multiple of 8)
    Bp = _round_up(B, TB)
    nbt = Bp // TB

    f32 = jnp.float32
    # NOTE: in production store W1/W2 as [in, out] up front; for PyTorch-layout
    # inputs the transpose is fused with the one-time pad/cast below.
    x_p = _pad2(x.astype(f32), Bp, Dp).astype(jnp.bfloat16)
    w1_p = _pad2(w1.T.astype(f32), Dp, Hp).astype(jnp.bfloat16)
    gamma_p = _pad2(gamma.reshape(1, -1).astype(f32), 1, Hp)
    beta_p = _pad2(beta.reshape(1, -1).astype(f32), 1, Hp)
    w2_p = _pad2(w2.T.astype(f32), Hp, Lp)
    b2_p = _pad2(b2.reshape(1, -1).astype(f32), 1, Lp)

    # VMEM budget: double-buffered streaming tiles + resident weights/vectors.
    x_tile_b = TB * Dp * 2
    o_tile_b = TB * Lp * 4
    h_tile_b = TB * Hp * 4
    w_bytes = Dp * Hp * 2 + Hp * Lp * 4
    vec_bytes = (4 * Hp + 2 * Lp) * 4
    est = 2 * (x_tile_b + o_tile_b) + h_tile_b + w_bytes + vec_bytes
    vmem_limit = int(min(max(4 * est, 32 * 2**20), 48 * 2**20))

    # ---- pass 1: batch statistics of h = x @ W1 ------------------------------
    stat_sum, stat_ssq = pl.pallas_call(
        _stats_kernel,
        grid=(nbt,),
        in_specs=[
            pl.BlockSpec((TB, Dp), lambda i: (i, 0)),
            pl.BlockSpec((Dp, Hp), lambda i: (0, 0)),
        ],
        out_specs=[
            pl.BlockSpec((1, Hp), lambda i: (0, 0)),
            pl.BlockSpec((1, Hp), lambda i: (0, 0)),
        ],
        out_shape=(
            jax.ShapeDtypeStruct((1, Hp), f32),
            jax.ShapeDtypeStruct((1, Hp), f32),
        ),
        compiler_params=pltpu.CompilerParams(
            dimension_semantics=("arbitrary",),   # resident accumulator outputs
            vmem_limit_bytes=vmem_limit,
        ),
        cost_estimate=pl.CostEstimate(
            flops=2 * Bp * Dp * Hp + 3 * Bp * Hp,
            transcendentals=0,
            bytes_accessed=nbt * x_tile_b + Dp * Hp * 2 + 2 * Hp * 4,
        ),
    )(x_p, w1_p)

    # ---- pass 2: normalize + ReLU + fc2 + log-softmax ------------------------
    kernel = functools.partial(_apply_kernel, inv_batch=1.0 / B, n_labels=L)
    out_p = pl.pallas_call(
        kernel,
        grid=(nbt,),
        in_specs=[
            pl.BlockSpec((1, Hp), lambda i: (0, 0)),   # sum
            pl.BlockSpec((1, Hp), lambda i: (0, 0)),   # sum of squares
            pl.BlockSpec((1, Hp), lambda i: (0, 0)),   # gamma
            pl.BlockSpec((1, Hp), lambda i: (0, 0)),   # beta
            pl.BlockSpec((TB, Dp), lambda i: (i, 0)),  # x tile (bf16)
            pl.BlockSpec((Dp, Hp), lambda i: (0, 0)),  # W1 (bf16, [in,out])
            pl.BlockSpec((Hp, Lp), lambda i: (0, 0)),  # W2 (f32, [in,out])
            pl.BlockSpec((1, Lp), lambda i: (0, 0)),   # b2
        ],
        out_specs=pl.BlockSpec((TB, Lp), lambda i: (i, 0)),
        out_shape=jax.ShapeDtypeStruct((Bp, Lp), f32),
        compiler_params=pltpu.CompilerParams(
            dimension_semantics=("parallel",),    # rows independent -> both TCs
            vmem_limit_bytes=vmem_limit,
        ),
        cost_estimate=pl.CostEstimate(
            flops=2 * Bp * (Dp * Hp + Hp * Lp) + 6 * Bp * Hp + 6 * Bp * Lp,
            transcendentals=Bp * Lp + Bp,
            bytes_accessed=nbt * (x_tile_b + o_tile_b) + w_bytes + vec_bytes,
        ),
    )(stat_sum, stat_ssq, gamma_p, beta_p, x_p, w1_p, w2_p, b2_p)

    return out_p[:B, :L]


if __name__ == "__main__":
    # Small shapes implied by the module: args.input_dim, args.hidden_dim, args.num_labels
    B, INPUT_DIM, HIDDEN_DIM, NUM_LABELS = 8, 32, 32, 4

    key = jax.random.PRNGKey(0)
    kx, kw1, kb1, kg, kbeta, kw2, kb2 = jax.random.split(key, 7)

    x = jax.random.normal(kx, (B, INPUT_DIM), dtype=jnp.float32)
    # Deterministic synthetic parameters (PyTorch layout [out, in] for weights)
    w1 = jax.random.normal(kw1, (HIDDEN_DIM, INPUT_DIM), dtype=jnp.float32) * 0.1
    b1 = jax.random.normal(kb1, (HIDDEN_DIM,), dtype=jnp.float32) * 0.1
    gamma = 1.0 + 0.1 * jax.random.normal(kg, (HIDDEN_DIM,), dtype=jnp.float32)
    beta = 0.1 * jax.random.normal(kbeta, (HIDDEN_DIM,), dtype=jnp.float32)
    w2 = jax.random.normal(kw2, (NUM_LABELS, HIDDEN_DIM), dtype=jnp.float32) * 0.1
    b2 = jax.random.normal(kb2, (NUM_LABELS,), dtype=jnp.float32) * 0.1

    out = jax.jit(adversarial_network_dann)(x, w1, b1, gamma, beta, w2, b2)
    jax.block_until_ready(out)

    hi = jax.lax.Precision.HIGHEST

    # Reference A: exact module math in f32 (PyTorch semantics, incl. b1).
    h = jnp.dot(x, w1.T, precision=hi) + b1
    mu = h.mean(axis=0, keepdims=True)
    var = ((h - mu) ** 2).mean(axis=0, keepdims=True)
    hr = jnp.maximum((h - mu) / jnp.sqrt(var + BN_EPS) * gamma + beta, 0.0)
    ref_f32 = jax.nn.log_softmax(jnp.dot(hr, w2.T, precision=hi) + b2, axis=1)

    # Reference B: same math but fc1 with bf16 operands / f32 accumulate
    # (what the kernel's MXU path computes); everything else in f32.
    h_b = jnp.dot(x.astype(jnp.bfloat16), w1.T.astype(jnp.bfloat16),
                  preferred_element_type=jnp.float32) + b1
    mu_b = h_b.mean(axis=0, keepdims=True)
    var_b = ((h_b - mu_b) ** 2).mean(axis=0, keepdims=True)
    hr_b = jnp.maximum((h_b - mu_b) * jax.lax.rsqrt(var_b + BN_EPS) * gamma + beta, 0.0)
    ref_bf16 = jax.nn.log_softmax(jnp.dot(hr_b, w2.T, precision=hi) + b2, axis=1)

    assert out.shape == (B, NUM_LABELS)
    assert bool(jnp.all(jnp.isfinite(out)))
    assert jnp.allclose(out, ref_bf16, atol=2e-2), "mismatch vs bf16-fc1 reference"
    assert jnp.allclose(out, ref_f32, atol=5e-2), "mismatch vs f32 module reference"

    print("KERNEL_OK")
</pallas_src>

<mosaic_0001>
module attributes {stable_mosaic.version = 11 : i64} {
  func.func @_stats_kernel(%arg0: i32, %arg1: memref<8x128xbf16, #tpu.memory_space<vmem>>, %arg2: memref<128x128xbf16, #tpu.memory_space<vmem>>, %arg3: memref<1x128xf32, #tpu.memory_space<vmem>>, %arg4: memref<1x128xf32, #tpu.memory_space<vmem>>) attributes {dimension_semantics = [#tpu.dimension_semantics<arbitrary>], iteration_bounds = array<i64: 1>, scalar_prefetch = 0 : i64, scratch_operands = 0 : i64, tpu.core_type = #tpu.core_type<tc>, window_params = [{transform_indices = @transform_0, window_bounds = array<i64: 8, 128>}, {pipeline_mode = #tpu.pipeline_mode<synchronous>, transform_indices = @transform_1, window_bounds = array<i64: 128, 128>}, {pipeline_mode = #tpu.pipeline_mode<synchronous>, transform_indices = @transform_2, window_bounds = array<i64: 1, 128>}, {pipeline_mode = #tpu.pipeline_mode<synchronous>, transform_indices = @transform_3, window_bounds = array<i64: 1, 128>}]} {
    %c0_i32 = arith.constant 0 : i32
    %0 = arith.cmpi eq, %arg0, %c0_i32 : i32
    %1 = arith.extui %0 : i1 to i32
    %c0_i32_0 = arith.constant 0 : i32
    %2 = arith.cmpi ne, %1, %c0_i32_0 : i32
    scf.if %2 {
      %cst_14 = arith.constant 0.000000e+00 : f32
      %17 = vector.broadcast %cst_14 : f32 to vector<1x128xf32>
      %c0_15 = arith.constant 0 : index
      %c0_16 = arith.constant 0 : index
      %18 = vector.load %arg3[%c0_15, %c0_16] : memref<1x128xf32, #tpu.memory_space<vmem>>, vector<1x128xf32>
      tpu.vector_store %arg3[%c0_15, %c0_16], %17 {strides = array<i32>} : memref<1x128xf32, #tpu.memory_space<vmem>>, vector<1x128xf32>,
      %cst_17 = arith.constant 0.000000e+00 : f32
      %19 = vector.broadcast %cst_17 : f32 to vector<1x128xf32>
      %c0_18 = arith.constant 0 : index
      %c0_19 = arith.constant 0 : index
      %20 = vector.load %arg4[%c0_18, %c0_19] : memref<1x128xf32, #tpu.memory_space<vmem>>, vector<1x128xf32>
      tpu.vector_store %arg4[%c0_18, %c0_19], %19 {strides = array<i32>} : memref<1x128xf32, #tpu.memory_space<vmem>>, vector<1x128xf32>,
    } else {
    }
    %c0 = arith.constant 0 : index
    %c0_1 = arith.constant 0 : index
    %3 = vector.load %arg1[%c0, %c0_1] : memref<8x128xbf16, #tpu.memory_space<vmem>>, vector<8x128xbf16>
    %c0_2 = arith.constant 0 : index
    %c0_3 = arith.constant 0 : index
    %4 = vector.load %arg2[%c0_2, %c0_3] : memref<128x128xbf16, #tpu.memory_space<vmem>>, vector<128x128xbf16>
    %cst = arith.constant dense<0.000000e+00> : vector<8x128xf32>
    %5 = tpu.matmul %3, %4, %cst {dimension_numbers = #tpu.dot_dimension_numbers<[1], [0], [0], [1], [0, 0, 1, 1], [], []>} : vector<8x128xbf16>, vector<128x128xbf16>, vector<8x128xf32> -> vector<8x128xf32>
    %c0_4 = arith.constant 0 : index
    %c0_5 = arith.constant 0 : index
    %6 = vector.load %arg3[%c0_4, %c0_5] : memref<1x128xf32, #tpu.memory_space<vmem>>, vector<1x128xf32>
    %cst_6 = arith.constant dense<0.000000e+00> : vector<128xf32>
    %7 = vector.multi_reduction <add>, %5, %cst_6 [0] : vector<8x128xf32> to vector<128xf32>
    %8 = vector.shape_cast %7 : vector<128xf32> to vector<1x128xf32>
    %9 = arith.addf %6, %8 : vector<1x128xf32>
    %c0_7 = arith.constant 0 : index
    %c0_8 = arith.constant 0 : index
    %10 = vector.load %arg3[%c0_7, %c0_8] : memref<1x128xf32, #tpu.memory_space<vmem>>, vector<1x128xf32>
    tpu.vector_store %arg3[%c0_7, %c0_8], %9 {strides = array<i32>} : memref<1x128xf32, #tpu.memory_space<vmem>>, vector<1x128xf32>,
    %c0_9 = arith.constant 0 : index
    %c0_10 = arith.constant 0 : index
    %11 = vector.load %arg4[%c0_9, %c0_10] : memref<1x128xf32, #tpu.memory_space<vmem>>, vector<1x128xf32>
    %12 = arith.mulf %5, %5 : vector<8x128xf32>
    %cst_11 = arith.constant dense<0.000000e+00> : vector<128xf32>
    %13 = vector.multi_reduction <add>, %12, %cst_11 [0] : vector<8x128xf32> to vector<128xf32>
    %14 = vector.shape_cast %13 : vector<128xf32> to vector<1x128xf32>
    %15 = arith.addf %11, %14 : vector<1x128xf32>
    %c0_12 = arith.constant 0 : index
    %c0_13 = arith.constant 0 : index
    %16 = vector.load %arg4[%c0_12, %c0_13] : memref<1x128xf32, #tpu.memory_space<vmem>>, vector<1x128xf32>
    tpu.vector_store %arg4[%c0_12, %c0_13], %15 {strides = array<i32>} : memref<1x128xf32, #tpu.memory_space<vmem>>, vector<1x128xf32>,
    return
  }
  func.func @transform_0(%arg0: i32) -> (i32, i32) {
    %c0_i32 = arith.constant 0 : i32
    %c0_i32_0 = arith.constant 0 : i32
    return %arg0, %c0_i32 : i32, i32
  }
  func.func @transform_1(%arg0: i32) -> (i32, i32) {
    %c0_i32 = arith.constant 0 : i32
    %c0_i32_0 = arith.constant 0 : i32
    %c0_i32_1 = arith.constant 0 : i32
    return %c0_i32, %c0_i32_0 : i32, i32
  }
  func.func @transform_2(%arg0: i32) -> (i32, i32) {
    %c0_i32 = arith.constant 0 : i32
    %c0_i32_0 = arith.constant 0 : i32
    %c0_i32_1 = arith.constant 0 : i32
    return %c0_i32, %c0_i32_0 : i32, i32
  }
  func.func @transform_3(%arg0: i32) -> (i32, i32) {
    %c0_i32 = arith.constant 0 : i32
    %c0_i32_0 = arith.constant 0 : i32
    %c0_i32_1 = arith.constant 0 : i32
    return %c0_i32, %c0_i32_0 : i32, i32
  }
}

module attributes {stable_mosaic.version = 11 : i64} {
  func.func @_apply_kernel(%arg0: i32, %arg1: memref<1x128xf32, #tpu.memory_space<vmem>>, %arg2: memref<1x128xf32, #tpu.memory_space<vmem>>, %arg3: memref<1x128xf32, #tpu.memory_space<vmem>>, %arg4: memref<1x128xf32, #tpu.memory_space<vmem>>, %arg5: memref<8x128xbf16, #tpu.memory_space<vmem>>, %arg6: memref<128x128xbf16, #tpu.memory_space<vmem>>, %arg7: memref<128x128xf32, #tpu.memory_space<vmem>>, %arg8: memref<1x128xf32, #tpu.memory_space<vmem>>, %arg9: memref<8x128xf32, #tpu.memory_space<vmem>>) attributes {dimension_semantics = [#tpu.dimension_semantics<parallel>], iteration_bounds = array<i64: 1>, scalar_prefetch = 0 : i64, scratch_operands = 0 : i64, tpu.core_type = #tpu.core_type<tc>, window_params = [{pipeline_mode = #tpu.pipeline_mode<synchronous>, transform_indices = @transform_0, window_bounds = array<i64: 1, 128>}, {pipeline_mode = #tpu.pipeline_mode<synchronous>, transform_indices = @transform_1, window_bounds = array<i64: 1, 128>}, {pipeline_mode = #tpu.pipeline_mode<synchronous>, transform_indices = @transform_2, window_bounds = array<i64: 1, 128>}, {pipeline_mode = #tpu.pipeline_mode<synchronous>, transform_indices = @transform_3, window_bounds = array<i64: 1, 128>}, {transform_indices = @transform_4, window_bounds = array<i64: 8, 128>}, {pipeline_mode = #tpu.pipeline_mode<synchronous>, transform_indices = @transform_5, window_bounds = array<i64: 128, 128>}, {pipeline_mode = #tpu.pipeline_mode<synchronous>, transform_indices = @transform_6, window_bounds = array<i64: 128, 128>}, {pipeline_mode = #tpu.pipeline_mode<synchronous>, transform_indices = @transform_7, window_bounds = array<i64: 1, 128>}, {transform_indices = @transform_8, window_bounds = array<i64: 8, 128>}]} {
    %c0 = arith.constant 0 : index
    %c0_0 = arith.constant 0 : index
    %0 = vector.load %arg1[%c0, %c0_0] : memref<1x128xf32, #tpu.memory_space<vmem>>, vector<1x128xf32>
    %cst = arith.constant 1.250000e-01 : f32
    %1 = vector.broadcast %cst : f32 to vector<1x128xf32>
    %2 = arith.mulf %0, %1 : vector<1x128xf32>
    %c0_1 = arith.constant 0 : index
    %c0_2 = arith.constant 0 : index
    %3 = vector.load %arg2[%c0_1, %c0_2] : memref<1x128xf32, #tpu.memory_space<vmem>>, vector<1x128xf32>
    %cst_3 = arith.constant 1.250000e-01 : f32
    %4 = vector.broadcast %cst_3 : f32 to vector<1x128xf32>
    %5 = arith.mulf %3, %4 : vector<1x128xf32>
    %6 = arith.mulf %2, %2 : vector<1x128xf32>
    %7 = arith.subf %5, %6 : vector<1x128xf32>
    %c0_4 = arith.constant 0 : index
    %c0_5 = arith.constant 0 : index
    %8 = vector.load %arg3[%c0_4, %c0_5] : memref<1x128xf32, #tpu.memory_space<vmem>>, vector<1x128xf32>
    %cst_6 = arith.constant 9.99999974E-6 : f32
    %9 = vector.broadcast %cst_6 : f32 to vector<1x128xf32>
    %10 = arith.addf %7, %9 : vector<1x128xf32>
    %11 = math.rsqrt %10 : vector<1x128xf32>
    %12 = arith.mulf %8, %11 : vector<1x128xf32>
    %c0_7 = arith.constant 0 : index
    %c0_8 = arith.constant 0 : index
    %13 = vector.load %arg4[%c0_7, %c0_8] : memref<1x128xf32, #tpu.memory_space<vmem>>, vector<1x128xf32>
    %14 = arith.mulf %2, %12 : vector<1x128xf32>
    %15 = arith.subf %13, %14 : vector<1x128xf32>
    %c0_9 = arith.constant 0 : index
    %c0_10 = arith.constant 0 : index
    %16 = vector.load %arg5[%c0_9, %c0_10] : memref<8x128xbf16, #tpu.memory_space<vmem>>, vector<8x128xbf16>
    %c0_11 = arith.constant 0 : index
    %c0_12 = arith.constant 0 : index
    %17 = vector.load %arg6[%c0_11, %c0_12] : memref<128x128xbf16, #tpu.memory_space<vmem>>, vector<128x128xbf16>
    %cst_13 = arith.constant dense<0.000000e+00> : vector<8x128xf32>
    %18 = tpu.matmul %16, %17, %cst_13 {dimension_numbers = #tpu.dot_dimension_numbers<[1], [0], [0], [1], [0, 0, 1, 1], [], []>} : vector<8x128xbf16>, vector<128x128xbf16>, vector<8x128xf32> -> vector<8x128xf32>
    %19 = vector.broadcast %12 : vector<1x128xf32> to vector<8x128xf32>
    %20 = arith.mulf %18, %19 : vector<8x128xf32>
    %21 = vector.broadcast %15 : vector<1x128xf32> to vector<8x128xf32>
    %22 = arith.addf %20, %21 : vector<8x128xf32>
    %cst_14 = arith.constant 0.000000e+00 : f32
    %23 = vector.broadcast %cst_14 : f32 to vector<8x128xf32>
    %24 = arith.maximumf %22, %23 : vector<8x128xf32>
    %c0_15 = arith.constant 0 : index
    %c0_16 = arith.constant 0 : index
    %25 = vector.load %arg7[%c0_15, %c0_16] : memref<128x128xf32, #tpu.memory_space<vmem>>, vector<128x128xf32>
    %cst_17 = arith.constant dense<0.000000e+00> : vector<8x128xf32>
    %26 = tpu.matmul %24, %25, %cst_17 {dimension_numbers = #tpu.dot_dimension_numbers<[1], [0], [0], [1], [0, 0, 1, 1], [], []>} : vector<8x128xf32>, vector<128x128xf32>, vector<8x128xf32> -> vector<8x128xf32>
    %c0_18 = arith.constant 0 : index
    %c0_19 = arith.constant 0 : index
    %27 = vector.load %arg8[%c0_18, %c0_19] : memref<1x128xf32, #tpu.memory_space<vmem>>, vector<1x128xf32>
    %28 = vector.broadcast %27 : vector<1x128xf32> to vector<8x128xf32>
    %29 = arith.addf %26, %28 : vector<8x128xf32>
    %30 = tpu.iota {dimensions = array<i32: 1>} : vector<8x128xi32>
    %c4_i32 = arith.constant 4 : i32
    %31 = vector.broadcast %c4_i32 : i32 to vector<8x128xi32>
    %32 = arith.cmpi slt, %30, %31 : vector<8x128xi32>
    %cst_20 = arith.constant -1.000000e+30 : f32
    %33 = vector.broadcast %cst_20 : f32 to vector<8x128xf32>
    %34 = arith.select %32, %29, %33 : vector<8x128xi1>, vector<8x128xf32>
    %cst_21 = arith.constant dense<0xFF800000> : vector<8xf32>
    %35 = vector.multi_reduction <maximumf>, %34, %cst_21 [1] : vector<8x128xf32> to vector<8xf32>
    %36 = vector.shape_cast %35 : vector<8xf32> to vector<8x1xf32>
    %37 = vector.broadcast %36 : vector<8x1xf32> to vector<8x128xf32>
    %38 = arith.subf %34, %37 : vector<8x128xf32>
    %39 = math.exp %38 : vector<8x128xf32>
    %cst_22 = arith.constant dense<0.000000e+00> : vector<8xf32>
    %40 = vector.multi_reduction <add>, %39, %cst_22 [1] : vector<8x128xf32> to vector<8xf32>
    %41 = vector.shape_cast %40 : vector<8xf32> to vector<8x1xf32>
    %42 = math.log %41 : vector<8x1xf32>
    %43 = vector.broadcast %42 : vector<8x1xf32> to vector<8x128xf32>
    %44 = arith.subf %38, %43 : vector<8x128xf32>
    %c0_23 = arith.constant 0 : index
    %c0_24 = arith.constant 0 : index
    %45 = vector.load %arg9[%c0_23, %c0_24] : memref<8x128xf32, #tpu.memory_space<vmem>>, vector<8x128xf32>
    tpu.vector_store %arg9[%c0_23, %c0_24], %44 {strides = array<i32>} : memref<8x128xf32, #tpu.memory_space<vmem>>, vector<8x128xf32>,
    return
  }
  func.func @transform_0(%arg0: i32) -> (i32, i32) {
    %c0_i32 = arith.constant 0 : i32
    %c0_i32_0 = arith.constant 0 : i32
    %c0_i32_1 = arith.constant 0 : i32
    return %c0_i32, %c0_i32_0 : i32, i32
  }
  func.func @transform_1(%arg0: i32) -> (i32, i32) {
    %c0_i32 = arith.constant 0 : i32
    %c0_i32_0 = arith.constant 0 : i32
    %c0_i32_1 = arith.constant 0 : i32
    return %c0_i32, %c0_i32_0 : i32, i32
  }
  func.func @transform_2(%arg0: i32) -> (i32, i32) {
    %c0_i32 = arith.constant 0 : i32
    %c0_i32_0 = arith.constant 0 : i32
    %c0_i32_1 = arith.constant 0 : i32
    return %c0_i32, %c0_i32_0 : i32, i32
  }
  func.func @transform_3(%arg0: i32) -> (i32, i32) {
    %c0_i32 = arith.constant 0 : i32
    %c0_i32_0 = arith.constant 0 : i32
    %c0_i32_1 = arith.constant 0 : i32
    return %c0_i32, %c0_i32_0 : i32, i32
  }
  func.func @transform_4(%arg0: i32) -> (i32, i32) {
    %c0_i32 = arith.constant 0 : i32
    %c0_i32_0 = arith.constant 0 : i32
    return %arg0, %c0_i32 : i32, i32
  }
  func.func @transform_5(%arg0: i32) -> (i32, i32) {
    %c0_i32 = arith.constant 0 : i32
    %c0_i32_0 = arith.constant 0 : i32
    %c0_i32_1 = arith.constant 0 : i32
    return %c0_i32, %c0_i32_0 : i32, i32
  }
  func.func @transform_6(%arg0: i32) -> (i32, i32) {
    %c0_i32 = arith.constant 0 : i32
    %c0_i32_0 = arith.constant 0 : i32
    %c0_i32_1 = arith.constant 0 : i32
    return %c0_i32, %c0_i32_0 : i32, i32
  }
  func.func @transform_7(%arg0: i32) -> (i32, i32) {
    %c0_i32 = arith.constant 0 : i32
    %c0_i32_0 = arith.constant 0 : i32
    %c0_i32_1 = arith.constant 0 : i32
    return %c0_i32, %c0_i32_0 : i32, i32
  }
  func.func @transform_8(%arg0: i32) -> (i32, i32) {
    %c0_i32 = arith.constant 0 : i32
    %c0_i32_0 = arith.constant 0 : i32
    return %arg0, %c0_i32 : i32, i32
  }
}

</mosaic_0001>

<bundles_post_ra>
// kernel: adversarial_network_dann.3
= control target key start
LH: loop header
LB: loop body
LE: loop exit
PB: predicated region body
PF: predicated region fallthrough
CT: control target
= control target key end

     0   :  { %v178_v51 = vlaneseq  ;;  %s382_s5 = inlined_call_operand.vmem [shape: bf16[128,128], index: 5, kind: input, shape index: {}]   ;;  %s383_s6 = inlined_call_operand.vmem [shape: f32[128,128], index: 6, kind: input, shape index: {}]   ;;  %s384_s4 = inlined_call_operand.vmem [shape: bf16[8,128], index: 4, kind: input, shape index: {}]   ;;  %s385_s7 = inlined_call_operand.vmem [shape: f32[1,128], index: 7, kind: input, shape index: {}]   ;;  %s386_s0 = inlined_call_operand.vmem [shape: f32[1,128], index: 0, kind: input, shape index: {}]   ;;  %s387_s1 = inlined_call_operand.vmem [shape: f32[1,128], index: 1, kind: input, shape index: {}]   ;;  %s388_s2 = inlined_call_operand.vmem [shape: f32[1,128], index: 2, kind: input, shape index: {}]   ;;  %s389_s3 = inlined_call_operand.vmem [shape: f32[1,128], index: 3, kind: input, shape index: {}]   ;;  %s390_s8 = inlined_call_operand.vmem [shape: f32[8,128], index: 8, kind: output, shape index: {}]  }
   0x1   :  { %v236_v0 = vld [vmem:[%s382_s5 + $0x38] sm:$0xff]  ;;  %v235_v1 = vld [vmem:[%s382_s5 + $0x30] sm:$0xff]  ;;  %v151_v4 = vld [vmem:[%s383_s6 + $0x68] sm:$0xff] }
   0x2   :  { %116 = vmatpush.bf16.msra.mxu0 %v236_v0  ;;  %v153_v2 = vld [vmem:[%s383_s6 + $0x78] sm:$0xff]  ;;  %v152_v3 = vld [vmem:[%s383_s6 + $0x70] sm:$0xff]  ;;  %v234_v5 = vld [vmem:[%s382_s5 + $0x28] sm:$0xff]  ;;  %v179_v52 = vand.u32 127, %v178_v51 }
   0x3   :  { %158 = vmatpush.msra.mxu1 %v153_v2  ;;  %v150_v6 = vld [vmem:[%s383_s6 + $0x60] sm:$0xff]  ;;  %v149_v7 = vld [vmem:[%s383_s6 + $0x58] sm:$0xff]  ;;  %v148_v9 = vld [vmem:[%s383_s6 + $0x50] sm:$0xff] }
   0x4   :  { %v233_v8 = vld [vmem:[%s382_s5 + $0x20] sm:$0xff]  ;;  %v147_v10 = vld [vmem:[%s383_s6 + $0x48] sm:$0xff]  ;;  %v232_v11 = vld [vmem:[%s382_s5 + $0x18] sm:$0xff]  ;;  %vm180_vm3 = vcmp.lt.s32.totalorder %v179_v52, 4 }
   0x5   :  { %159 = vmatpush.msra.mxu1 %v152_v3  ;;  %v146_v12 = vld [vmem:[%s383_s6 + $0x40] sm:$0xff]  ;;  %v145_v13 = vld [vmem:[%s383_s6 + $0x38] sm:$0xff]  ;;  %v231_v14 = vld [vmem:[%s382_s5 + $0x10] sm:$0xff] }
   0x6   :  { %117 = vmatpush.bf16.msra.mxu0 %v235_v1  ;;  %v144_v15 = vld [vmem:[%s383_s6 + $0x30] sm:$0xff]  ;;  %v143_v16 = vld [vmem:[%s383_s6 + $0x28] sm:$0xff]  ;;  %v142_v18 = vld [vmem:[%s383_s6 + $0x20] sm:$0xff] }
   0x7   :  { %160 = vmatpush.msra.mxu1 %v151_v4  ;;  %v230_v17 = vld [vmem:[%s382_s5 + $0x8] sm:$0xff]  ;;  %v229_v19 = vld [vmem:[%s382_s5] sm:$0xff]  ;;  %v141_v30 = vld [vmem:[%s383_s6 + $0x18] sm:$0xff] }
   0x8   :  { %v51_v20 = vld [vmem:[%s384_s4] sm:$0xf]  ;;  %v140_v32 = vld [vmem:[%s383_s6 + $0x10] sm:$0xff]  ;;  %v139_v33 = vld [vmem:[%s383_s6 + $0x8] sm:$0xff] }
   0x9   :  { %161 = vmatpush.msra.mxu1 %v150_v6  ;;  %v29_v21 = vld [vmem:[%s386_s0] sm:$0x1] }
   0xa   :  { %118 = vmatpush.bf16.msra.mxu0 %v234_v5  ;;  %v30_v22 = vmul.f32 0.125, %v29_v21  ;;  %v31_v23 = vld [vmem:[%s387_s1] sm:$0x1] }
   0xb   :  { %162 = vmatpush.msra.mxu1 %v149_v7  ;;  %v32_v24 = vmul.f32 0.125, %v31_v23  ;;  %v138_v34 = vld [vmem:[%s383_s6] sm:$0xff] }
   0xc   :  { %v33_v25 = vmul.f32 %v30_v22, %v30_v22  ;;  %v35_v38 = vld [vmem:[%s388_s2] sm:$0x1] }
   0xd   :  { %163 = vmatpush.msra.mxu1 %v148_v9  ;;  %v48_v42 = vld [vmem:[%s389_s3] sm:$0x1] }
   0xe   :  { %119 = vmatpush.bf16.msra.mxu0 %v233_v8  ;;  %v34_v26 = vsub.f32 %v32_v24, %v33_v25  ;;  %v237_v53 = vld [vmem:[%s385_s7] ss:$0 sm:$0xff] }
   0xf   :  { %164 = vmatpush.msra.mxu1 %v147_v10 }
  0x10   :  { %v36_v27 = vadd.f32 1e-05, %v34_v26 }
  0x11   :  { %165 = vmatpush.msra.mxu1 %v146_v12 }
  0x12   :  { %120 = vmatpush.bf16.msra.mxu0 %v232_v11  ;;  %238 = vrsqrt.f32 %v36_v27  ;;  %vm43_vm0 = vweird.f32 %v36_v27 }
  0x13   :  { %166 = vmatpush.msra.mxu1 %v145_v13 }
  0x15   :  { %167 = vmatpush.msra.mxu1 %v144_v15 }
  0x16   :  { %121 = vmatpush.bf16.msra.mxu0 %v231_v14 }
  0x17   :  { %168 = vmatpush.msra.mxu1 %v143_v16 }
  0x18   :  { %v239_v28 = vpop.eup %238 }
  0x19   :  { %169 = vmatpush.msra.mxu1 %v142_v18  ;;  %v38_v29 = vmul.f32 %v239_v28, %v36_v27  ;;  %vm44_vm1 = vweird.f32 %v239_v28 }
  0x1a   :  { %122 = vmatpush.bf16.msra.mxu0 %v230_v17  ;;  %vm45_vm2 = vmor %vm43_vm0, %vm44_vm1 }
  0x1b   :  { %v39_v31 = vmul.f32 %v239_v28, %v38_v29  ;;  %170 = vmatpush.msra.mxu1 %v141_v30 }
  0x1d   :  { %171 = vmatpush.msra.mxu1 %v140_v32  ;;  %v40_v35 = vmul.f32 0.5, %v39_v31 }
  0x1e   :  { %123 = vmatpush.bf16.msra.mxu0 %v229_v19 }
  0x1f   :  { %172 = vmatpush.msra.mxu1 %v139_v33  ;;  %v41_v36 = vsub.f32 1.5, %v40_v35 }
  0x21   :  { %124 = vmatmul.bf16.vlgmr.msra.gmra.mxu0 %v51_v20  ;;  %173 = vmatpush.msra.mxu1 %v138_v34  ;;  %v42_v37 = vmul.f32 %v239_v28, %v41_v36 }
  0x23   :  { %v46_v39 = vsel %vm45_vm2, %v239_v28, %v42_v37 }
  0x24   :  { %v47_v40 = vmul.f32 %v46_v39, %v35_v38 }
  0x26   :  { %v49_v41 = vmul.f32 %v47_v40, %v30_v22  ;;  %v130_v44 = vperm.slane %v47_v40, 0 }
  0x28   :  { %v50_v43 = vsub.f32 %v48_v42, %v49_v41 }
  0x2a   :  { %v134_v45 = vperm.slane %v50_v43, 0 }
  0x9e   :  { %v125_v46 = vpop.f32.mrf.mxu0 }
  0x9f   :  { %v132_v47 = vmul.f32 %v130_v44, %v125_v46 }
  0xa1   :  { %v136_v48 = vadd.f32 %v134_v45, %v132_v47 }
  0xa3   :  { %v137_v49 = vmax.f32 %v136_v48, 0.0 }
  0xa5   :  { %174 = vmatmul.f32.vlgmr.msra.gmra.mxu1 %v137_v49 }
  0xa6   :  { %v127_v50 = vpop.f32.mrf.mxu0 }
 0x122   :  { %v175_v54 = vpop.f32.mrf.mxu1 }
 0x123   :  { %v176_v55 = vadd.f32 %v237_v53, %v175_v54 }
 0x125   :  { %v181_v56 = vsel %vm180_vm3, %v176_v55, -1e+30 }
 0x126   :  { %182 = vmax.xlane.f32.xlu0 %v181_v56 }
 0x199   :  { %v183_v57 = vpop.xlane.xlu0 %182 }
 0x19a   :  { %v184_v58 = vsub.f32 %v181_v56, %v183_v57 }
 0x19c   :  { %v185_v59 = vmul.f32 1.442695, %v184_v58 }
 0x19e   :  { %240 = vpow2.f32 %v185_v59 }
 0x1a4   :  { %v241_v60 = vpop.eup %240 }
 0x1a5   :  { %187 = vadd.xlane.f32.xlu0 %v241_v60 }
 0x218   :  { %v188_v61 = vpop.xlane.xlu0 %187 }
 0x219   :  { %242 = vlog2.f32 %v188_v61 }
 0x21f   :  { %v243_v62 = vpop.eup %242 }
 0x220   :  { %v190_v63 = vmul.f32 0.6931472, %v243_v62 }
 0x222   :  { %v191_v0 = vsub.f32 %v184_v58, %v190_v63 }
 0x224   :  { %192 = vst [vmem:[%s390_s8] sm:$0xff] %v191_v0 }

// kernel: adversarial_network_dann.2
= control target key start
LH: loop header
LB: loop body
LE: loop exit
PB: predicated region body
PF: predicated region fallthrough
CT: control target
= control target key end

     0   :  { %v165_v2 = vmov 0.0   ;;  %s231_s1 = inlined_call_operand.vmem [shape: bf16[128,128], index: 1, kind: input, shape index: {}]   ;;  %s232_s2 = inlined_call_operand.vmem [shape: f32[1,128], index: 2, kind: output, shape index: {0}]   ;;  %s233_s3 = inlined_call_operand.vmem [shape: f32[1,128], index: 3, kind: output, shape index: {1}]   ;;  %s234_s0 = inlined_call_operand.vmem [shape: bf16[8,128], index: 0, kind: input, shape index: {}]  }
   0x1   :  { %v163_v0 = vld [vmem:[%s231_s1 + $0x38] sm:$0xff]  ;;  %v162_v1 = vld [vmem:[%s231_s1 + $0x30] sm:$0xff]  ;;  %17 = vst [vmem:[%s232_s2] sm:$0x1] %v165_v2  ;;  %v161_v3 = vld [vmem:[%s231_s1 + $0x28] sm:$0xff] }
   0x2   :  { %84 = vmatpush.bf16.msra.mxu0 %v163_v0  ;;  %18 = vst [vmem:[%s233_s3] sm:$0x1] %v165_v2  ;;  %v160_v4 = vld [vmem:[%s231_s1 + $0x20] sm:$0xff]  ;;  %v159_v5 = vld [vmem:[%s231_s1 + $0x18] sm:$0xff]  ;;  %v158_v6 = vld [vmem:[%s231_s1 + $0x10] sm:$0xff] }
   0x3   :  { %v157_v7 = vld [vmem:[%s231_s1 + $0x8] sm:$0xff]  ;;  %v156_v8 = vld [vmem:[%s231_s1] sm:$0xff] }
   0x4   :  { %v19_v9 = vld [vmem:[%s234_s0] sm:$0xf] }
   0x6   :  { %85 = vmatpush.bf16.msra.mxu0 %v162_v1 }
   0x8   :  { %v97_v22 = vld [vmem:[%s232_s2] sm:$0x1] }
   0x9   :  { %v106_v25 = vld [vmem:[%s233_s3] sm:$0x1] }
   0xa   :  { %86 = vmatpush.bf16.msra.mxu0 %v161_v3 }
   0xe   :  { %87 = vmatpush.bf16.msra.mxu0 %v160_v4 }
  0x12   :  { %88 = vmatpush.bf16.msra.mxu0 %v159_v5 }
  0x16   :  { %89 = vmatpush.bf16.msra.mxu0 %v158_v6 }
  0x1a   :  { %90 = vmatpush.bf16.msra.mxu0 %v157_v7 }
  0x1e   :  { %91 = vmatpush.bf16.msra.mxu0 %v156_v8 }
  0x21   :  { %92 = vmatmul.bf16.vlgmr.msra.gmra.mxu0 %v19_v9 }
  0x9e   :  { %v93_v10 = vpop.f32.mrf.mxu0 }
  0x9f   :  { %v98_v11 = vrot.slane %v93_v10, 4  ;;  %v107_v12 = vmul.f32 %v93_v10, %v93_v10 }
  0xa1   :  { %v99_v13 = vadd.f32 %v98_v11, %v93_v10  ;;  %v108_v14 = vrot.slane %v107_v12, 4 }
  0xa3   :  { %v100_v15 = vrot.slane %v99_v13, 2  ;;  %v109_v16 = vadd.f32 %v108_v14, %v107_v12 }
  0xa5   :  { %v101_v17 = vadd.f32 %v100_v15, %v99_v13  ;;  %v110_v18 = vrot.slane %v109_v16, 2 }
  0xa6   :  { %v95_v19 = vpop.f32.mrf.mxu0 }
  0xa7   :  { %v102_v20 = vrot.slane %v101_v17, 1  ;;  %v111_v21 = vadd.f32 %v110_v18, %v109_v16 }
  0xa9   :  { %v103_v23 = vadd.f32 %v102_v20, %v101_v17  ;;  %v112_v24 = vrot.slane %v111_v21, 1 }
  0xab   :  { %v104_v26 = vadd.f32 %v103_v23, %v97_v22  ;;  %v113_v27 = vadd.f32 %v112_v24, %v111_v21 }
  0xad   :  { %105 = vst [vmem:[%s232_s2] sm:$0x1] %v104_v26  ;;  %v114_v28 = vadd.f32 %v113_v27, %v106_v25 }
  0xaf   :  { %115 = vst [vmem:[%s233_s3] sm:$0x1] %v114_v28 }

</bundles_post_ra>
